<compile_context>
chip_gen: v7x
topology: tpu7x:2x2x1
jax: 0.10.0
libtpu: 0.0.40
codegen_flags: <defaults>
</compile_context>

<pallas_src>
import jax
import jax.numpy as jnp
from jax.experimental import pallas as pl
from jax.experimental.pallas import tpu as pltpu


def _round_up(x, m):
    return ((x + m - 1) // m) * m


def mlp4_kernel(efgi_ref, wblk_ref, w1_ref, b1_ref, w2_ref, b2_ref, out_ref):
    # ---- Stage 1 (VPU): fused fc_E1/fc_F1/fc_G1/fc_H1 + ReLU ----------------
    # Equivalent to [TB,4] @ block_diag([4,256]) + bias, but with K=4 the MXU
    # would be ~empty; 4 broadcast FMAs on the otherwise-idle VALU are cheaper.
    x = efgi_ref[...]                                  # [TB, 4]
    wblk = wblk_ref[...]                               # [5, 256]: rows 0..3 = W, row 4 = bias
    acc = wblk[4:5, :]                                 # [1, 256]; broadcasts on first add
    for k in range(4):                                 # static unroll
        acc = acc + x[:, k:k + 1] * wblk[k:k + 1, :]
    x_all = jnp.maximum(acc, 0.0)                      # [TB, 256]

    # ---- Stage 2 (MXU): fc1 + ReLU ------------------------------------------
    h1 = jnp.dot(x_all, w1_ref[...],
                 preferred_element_type=jnp.float32) + b1_ref[...]
    h1 = jnp.maximum(h1, 0.0)                          # [TB, 64]

    # ---- Stage 3 (MXU): fc2, compact output (no lane padding) ---------------
    out_ref[...] = jnp.dot(h1, w2_ref[...],
                           preferred_element_type=jnp.float32) + b2_ref[...]


def init_linear_params(key, in_features, out_features):
    """PyTorch-style Linear init: U(-1/sqrt(fan_in), 1/sqrt(fan_in)).
    Stored pre-transposed as [in_features, out_features]; bias [1, out_features]."""
    kw, kb = jax.random.split(key)
    bound = 1.0 / jnp.sqrt(jnp.float32(in_features))
    w = jax.random.uniform(kw, (in_features, out_features), jnp.float32, -bound, bound)
    b = jax.random.uniform(kb, (1, out_features), jnp.float32, -bound, bound)
    return w, b


def make_params(output_dim, seed=0):
    keys = jax.random.split(jax.random.PRNGKey(seed), 6)
    wE, bE = init_linear_params(keys[0], 1, 64)
    wF, bF = init_linear_params(keys[1], 1, 64)
    wG, bG = init_linear_params(keys[2], 1, 64)
    wH, bH = init_linear_params(keys[3], 1, 64)
    w1, b1 = init_linear_params(keys[4], 256, 64)
    w2, b2 = init_linear_params(keys[5], 64, output_dim)
    return (wE, bE, wF, bF, wG, bG, wH, bH, w1, b1, w2, b2)


def pack_params(params):
    """Pack the 12 PyTorch-layout tensors into 5 kernel-friendly arrays."""
    wE, bE, wF, bF, wG, bG, wH, bH, w1, b1, w2, b2 = params
    # Rows 0..3: block-diagonal branch weights (row k carries branch k's 64 weights
    # in cols k*64:(k+1)*64). Row 4: concatenated branch biases.
    wblk = jnp.zeros((5, 256), jnp.float32)
    wblk = wblk.at[0, 0:64].set(wE[0])
    wblk = wblk.at[1, 64:128].set(wF[0])
    wblk = wblk.at[2, 128:192].set(wG[0])
    wblk = wblk.at[3, 192:256].set(wH[0])
    wblk = wblk.at[4, :].set(jnp.concatenate([bE, bF, bG, bH], axis=1)[0])
    return (wblk, w1, b1, w2, b2)


def _choose_batch_tile(batch, block_batch):
    """Pick the batch tile: as large as allowed (amortize the ~0.35us/step
    pipeline overhead) but always giving >=2 grid steps when the batch permits,
    so both v7x TensorCores get work on the 'parallel' axis."""
    padded_batch = _round_up(batch, 8)
    tb = min(block_batch, padded_batch)
    if padded_batch >= 16:
        half = _round_up((batch + 1) // 2, 8)   # largest tile with >=2 steps
        tb = min(tb, half)
    return max(tb, 8)


def mlp_model4_forward(A, B, C, D, E, F, G, H, I, packed_params,
                       *, block_batch=2048):
    # A, B, C, D, H are unused by the PyTorch forward; ignored here too.
    del A, B, C, D, H
    wblk, w1, b1, w2, b2 = packed_params
    output_dim = w2.shape[1]

    batch = E.shape[0]
    efgi = jnp.concatenate([E, F, G, I], axis=1)               # [batch, 4]

    # Batch tile (multiple of 8 sublanes); pad batch rows to a tile multiple.
    # Per-tile VMEM ~ tb*(x_all 1KB + h1 0.25KB + in/out bufs) -> ~3 MiB at tb=2048,
    # comfortably inside the 32 MiB scoped budget on every generation incl. v7x.
    tb = _choose_batch_tile(batch, block_batch)
    padded = _round_up(batch, tb)
    if padded != batch:
        efgi = jnp.pad(efgi, ((0, padded - batch), (0, 0)))
    grid = (padded // tb,)

    out = pl.pallas_call(
        mlp4_kernel,
        out_shape=jax.ShapeDtypeStruct((padded, output_dim), jnp.float32),
        grid=grid,
        in_specs=[
            pl.BlockSpec((tb, 4), lambda i: (i, 0)),             # packed [E,F,G,I]
            pl.BlockSpec((5, 256), lambda i: (0, 0)),            # block-diag branch W + bias
            pl.BlockSpec((256, 64), lambda i: (0, 0)),           # fc1 W
            pl.BlockSpec((1, 64), lambda i: (0, 0)),             # fc1 b
            pl.BlockSpec((64, output_dim), lambda i: (0, 0)),    # fc2 W (compact)
            pl.BlockSpec((1, output_dim), lambda i: (0, 0)),     # fc2 b (compact)
        ],
        out_specs=pl.BlockSpec((tb, output_dim), lambda i: (i, 0)),
        compiler_params=pltpu.CompilerParams(
            dimension_semantics=("parallel",),   # batch axis -> sharded over 2 TCs on v7x
            vmem_limit_bytes=32 * 1024 * 1024,   # portable budget (v7x has 64 MiB physical)
        ),
    )(efgi, wblk, w1, b1, w2, b2)

    return out[:batch]                            # row slice only; columns already compact


def mlp_model4_reference(E, F, G, I, params):
    """Pure-JAX reference using the original (unpacked) parameters."""
    wE, bE, wF, bF, wG, bG, wH, bH, w1, b1, w2, b2 = params
    relu = lambda x: jnp.maximum(x, 0.0)
    x_e = relu(E @ wE + bE)
    x_f = relu(F @ wF + bF)
    x_g = relu(G @ wG + bG)
    x_h = relu(I @ wH + bH)
    x_all = jnp.concatenate([x_e, x_f, x_g, x_h], axis=1)
    h1 = relu(x_all @ w1 + b1)
    return h1 @ w2 + b2


if __name__ == "__main__":
    batch = 200          # not a tile multiple -> exercises padding + 2-step grid
    output_dim = 8

    key = jax.random.PRNGKey(0)
    keys = jax.random.split(key, 9)
    # Each scalar-feature input is [batch, 1], matching Linear(1, 64).
    A, B, C, D, E, F, G, H, I = [
        jax.random.normal(k, (batch, 1), jnp.float32) for k in keys
    ]

    params = make_params(output_dim, seed=0)
    packed = pack_params(params)

    out = mlp_model4_forward(A, B, C, D, E, F, G, H, I, packed)
    out = jax.block_until_ready(out)

    ref = mlp_model4_reference(E, F, G, I, params)
    assert out.shape == (batch, output_dim)
    assert jnp.allclose(out, ref, atol=1e-5, rtol=1e-5), "mismatch vs reference"

    print("KERNEL_OK")
</pallas_src>

<mosaic_0001>
module attributes {stable_mosaic.version = 11 : i64} {
  func.func @mlp4_kernel(%arg0: i32, %arg1: memref<104x4xf32, #tpu.memory_space<vmem>>, %arg2: memref<5x256xf32, #tpu.memory_space<vmem>>, %arg3: memref<256x64xf32, #tpu.memory_space<vmem>>, %arg4: memref<1x64xf32, #tpu.memory_space<vmem>>, %arg5: memref<64x8xf32, #tpu.memory_space<vmem>>, %arg6: memref<1x8xf32, #tpu.memory_space<vmem>>, %arg7: memref<104x8xf32, #tpu.memory_space<vmem>>) attributes {dimension_semantics = [#tpu.dimension_semantics<parallel>], iteration_bounds = array<i64: 2>, scalar_prefetch = 0 : i64, scratch_operands = 0 : i64, tpu.core_type = #tpu.core_type<tc>, window_params = [{transform_indices = @transform_0, window_bounds = array<i64: 104, 4>}, {pipeline_mode = #tpu.pipeline_mode<synchronous>, transform_indices = @transform_1, window_bounds = array<i64: 5, 256>}, {pipeline_mode = #tpu.pipeline_mode<synchronous>, transform_indices = @transform_2, window_bounds = array<i64: 256, 64>}, {pipeline_mode = #tpu.pipeline_mode<synchronous>, transform_indices = @transform_3, window_bounds = array<i64: 1, 64>}, {pipeline_mode = #tpu.pipeline_mode<synchronous>, transform_indices = @transform_4, window_bounds = array<i64: 64, 8>}, {pipeline_mode = #tpu.pipeline_mode<synchronous>, transform_indices = @transform_5, window_bounds = array<i64: 1, 8>}, {transform_indices = @transform_6, window_bounds = array<i64: 104, 8>}]} {
    %c0 = arith.constant 0 : index
    %c0_0 = arith.constant 0 : index
    %0 = vector.load %arg1[%c0, %c0_0] : memref<104x4xf32, #tpu.memory_space<vmem>>, vector<104x4xf32>
    %c0_1 = arith.constant 0 : index
    %c0_2 = arith.constant 0 : index
    %1 = vector.load %arg2[%c0_1, %c0_2] : memref<5x256xf32, #tpu.memory_space<vmem>>, vector<5x256xf32>
    %2 = vector.extract_strided_slice %1 {offsets = [4, 0], sizes = [1, 256], strides = [1, 1]} : vector<5x256xf32> to vector<1x256xf32>
    %3 = vector.extract_strided_slice %0 {offsets = [0, 0], sizes = [104, 1], strides = [1, 1]} : vector<104x4xf32> to vector<104x1xf32>
    %4 = vector.extract_strided_slice %1 {offsets = [0, 0], sizes = [1, 256], strides = [1, 1]} : vector<5x256xf32> to vector<1x256xf32>
    %5 = vector.broadcast %3 : vector<104x1xf32> to vector<104x256xf32>
    %6 = vector.broadcast %4 : vector<1x256xf32> to vector<104x256xf32>
    %7 = arith.mulf %5, %6 : vector<104x256xf32>
    %8 = vector.broadcast %2 : vector<1x256xf32> to vector<104x256xf32>
    %9 = arith.addf %8, %7 : vector<104x256xf32>
    %10 = vector.extract_strided_slice %0 {offsets = [0, 1], sizes = [104, 1], strides = [1, 1]} : vector<104x4xf32> to vector<104x1xf32>
    %11 = vector.extract_strided_slice %1 {offsets = [1, 0], sizes = [1, 256], strides = [1, 1]} : vector<5x256xf32> to vector<1x256xf32>
    %12 = vector.broadcast %10 : vector<104x1xf32> to vector<104x256xf32>
    %13 = vector.broadcast %11 : vector<1x256xf32> to vector<104x256xf32>
    %14 = arith.mulf %12, %13 : vector<104x256xf32>
    %15 = arith.addf %9, %14 : vector<104x256xf32>
    %16 = vector.extract_strided_slice %0 {offsets = [0, 2], sizes = [104, 1], strides = [1, 1]} : vector<104x4xf32> to vector<104x1xf32>
    %17 = vector.extract_strided_slice %1 {offsets = [2, 0], sizes = [1, 256], strides = [1, 1]} : vector<5x256xf32> to vector<1x256xf32>
    %18 = vector.broadcast %16 : vector<104x1xf32> to vector<104x256xf32>
    %19 = vector.broadcast %17 : vector<1x256xf32> to vector<104x256xf32>
    %20 = arith.mulf %18, %19 : vector<104x256xf32>
    %21 = arith.addf %15, %20 : vector<104x256xf32>
    %22 = vector.extract_strided_slice %0 {offsets = [0, 3], sizes = [104, 1], strides = [1, 1]} : vector<104x4xf32> to vector<104x1xf32>
    %23 = vector.extract_strided_slice %1 {offsets = [3, 0], sizes = [1, 256], strides = [1, 1]} : vector<5x256xf32> to vector<1x256xf32>
    %24 = vector.broadcast %22 : vector<104x1xf32> to vector<104x256xf32>
    %25 = vector.broadcast %23 : vector<1x256xf32> to vector<104x256xf32>
    %26 = arith.mulf %24, %25 : vector<104x256xf32>
    %27 = arith.addf %21, %26 : vector<104x256xf32>
    %cst = arith.constant 0.000000e+00 : f32
    %28 = vector.broadcast %cst : f32 to vector<104x256xf32>
    %29 = arith.maximumf %27, %28 : vector<104x256xf32>
    %c0_3 = arith.constant 0 : index
    %c0_4 = arith.constant 0 : index
    %30 = vector.load %arg3[%c0_3, %c0_4] : memref<256x64xf32, #tpu.memory_space<vmem>>, vector<256x64xf32>
    %cst_5 = arith.constant dense<0.000000e+00> : vector<104x64xf32>
    %31 = tpu.matmul %29, %30, %cst_5 {dimension_numbers = #tpu.dot_dimension_numbers<[1], [0], [0], [1], [0, 0, 1, 1], [], []>} : vector<104x256xf32>, vector<256x64xf32>, vector<104x64xf32> -> vector<104x64xf32>
    %c0_6 = arith.constant 0 : index
    %c0_7 = arith.constant 0 : index
    %32 = vector.load %arg4[%c0_6, %c0_7] : memref<1x64xf32, #tpu.memory_space<vmem>>, vector<1x64xf32>
    %33 = vector.broadcast %32 : vector<1x64xf32> to vector<104x64xf32>
    %34 = arith.addf %31, %33 : vector<104x64xf32>
    %cst_8 = arith.constant 0.000000e+00 : f32
    %35 = vector.broadcast %cst_8 : f32 to vector<104x64xf32>
    %36 = arith.maximumf %34, %35 : vector<104x64xf32>
    %c0_9 = arith.constant 0 : index
    %c0_10 = arith.constant 0 : index
    %37 = vector.load %arg5[%c0_9, %c0_10] : memref<64x8xf32, #tpu.memory_space<vmem>>, vector<64x8xf32>
    %cst_11 = arith.constant dense<0.000000e+00> : vector<104x8xf32>
    %38 = tpu.matmul %36, %37, %cst_11 {dimension_numbers = #tpu.dot_dimension_numbers<[1], [0], [0], [1], [0, 0, 1, 1], [], []>} : vector<104x64xf32>, vector<64x8xf32>, vector<104x8xf32> -> vector<104x8xf32>
    %c0_12 = arith.constant 0 : index
    %c0_13 = arith.constant 0 : index
    %39 = vector.load %arg6[%c0_12, %c0_13] : memref<1x8xf32, #tpu.memory_space<vmem>>, vector<1x8xf32>
    %40 = vector.broadcast %39 : vector<1x8xf32> to vector<104x8xf32>
    %41 = arith.addf %38, %40 : vector<104x8xf32>
    %c0_14 = arith.constant 0 : index
    %c0_15 = arith.constant 0 : index
    %42 = vector.load %arg7[%c0_14, %c0_15] : memref<104x8xf32, #tpu.memory_space<vmem>>, vector<104x8xf32>
    tpu.vector_store %arg7[%c0_14, %c0_15], %41 {strides = array<i32>} : memref<104x8xf32, #tpu.memory_space<vmem>>, vector<104x8xf32>,
    return
  }
  func.func @transform_0(%arg0: i32) -> (i32, i32) {
    %c0_i32 = arith.constant 0 : i32
    %c0_i32_0 = arith.constant 0 : i32
    return %arg0, %c0_i32 : i32, i32
  }
  func.func @transform_1(%arg0: i32) -> (i32, i32) {
    %c0_i32 = arith.constant 0 : i32
    %c0_i32_0 = arith.constant 0 : i32
    %c0_i32_1 = arith.constant 0 : i32
    return %c0_i32, %c0_i32_0 : i32, i32
  }
  func.func @transform_2(%arg0: i32) -> (i32, i32) {
    %c0_i32 = arith.constant 0 : i32
    %c0_i32_0 = arith.constant 0 : i32
    %c0_i32_1 = arith.constant 0 : i32
    return %c0_i32, %c0_i32_0 : i32, i32
  }
  func.func @transform_3(%arg0: i32) -> (i32, i32) {
    %c0_i32 = arith.constant 0 : i32
    %c0_i32_0 = arith.constant 0 : i32
    %c0_i32_1 = arith.constant 0 : i32
    return %c0_i32, %c0_i32_0 : i32, i32
  }
  func.func @transform_4(%arg0: i32) -> (i32, i32) {
    %c0_i32 = arith.constant 0 : i32
    %c0_i32_0 = arith.constant 0 : i32
    %c0_i32_1 = arith.constant 0 : i32
    return %c0_i32, %c0_i32_0 : i32, i32
  }
  func.func @transform_5(%arg0: i32) -> (i32, i32) {
    %c0_i32 = arith.constant 0 : i32
    %c0_i32_0 = arith.constant 0 : i32
    %c0_i32_1 = arith.constant 0 : i32
    return %c0_i32, %c0_i32_0 : i32, i32
  }
  func.func @transform_6(%arg0: i32) -> (i32, i32) {
    %c0_i32 = arith.constant 0 : i32
    %c0_i32_0 = arith.constant 0 : i32
    return %arg0, %c0_i32 : i32, i32
  }
}

</mosaic_0001>

<bundles_post_ra>
// kernel: tpu_custom_call.1
= control target key start
LH: loop header
LB: loop body
LE: loop exit
PB: predicated region body
PF: predicated region fallthrough
CT: control target
= control target key end

     0   :  { %s1524_s21 = smov 0   ;;  %s2033_s0 = inlined_call_operand.vmem [shape: f32[208,4], index: 0, kind: input, shape index: {}]   ;;  %s2034_s1 = inlined_call_operand.vmem [shape: f32[5,256], index: 1, kind: input, shape index: {}]   ;;  %s2035_s2 = inlined_call_operand.vmem [shape: f32[256,64], index: 2, kind: input, shape index: {}]   ;;  %s2036_s3 = inlined_call_operand.vmem [shape: f32[1,64], index: 3, kind: input, shape index: {}]   ;;  %s2037_s4 = inlined_call_operand.vmem [shape: f32[64,8], index: 4, kind: input, shape index: {}]   ;;  %s2038_s5 = inlined_call_operand.vmem [shape: f32[1,8], index: 5, kind: input, shape index: {}]   ;;  %s2039_s6 = inlined_call_operand.vmem [shape: f32[208,8], index: 6, kind: output, shape index: {}]  }
   0x1 LB: > { %s1202_s22 = sadd.s32 4294967295, %s1480_s21   ;;  %p1206_p0 = scmp.ge.s32.totalorder %s1480_s21, 1  ;;  %s1480_s21 = sphi %s1524_s21, %s16_s21  }
   0x2   : > { %p213_p1 = scmp.lt.s32.totalorder %s1480_s21, 3 }
   0x4   : > { %p214_p2 = pnand %p1206_p0, %p213_p1 }
   0x5   : > { %s243_s23 = smul.u32 (!%p214_p2), 13, %s1202_s22  ;;  %v781_v0 = vld [vmem:[%s2035_s2 + $0x80] sm:$0xff] (!%p214_p2)  ;;  %v1482_v1 = vmov (!%p214_p2), 0   ;;  %v782_v2 = vld [vmem:[%s2035_s2 + $0x88] sm:$0xff] (!%p214_p2)  ;;  %v783_v7 = vld [vmem:[%s2035_s2 + $0x90] sm:$0xff] (!%p214_p2)  ;;  %v1483_v22 = vmov (!%p214_p2), 2  }
   0x6   : > { %217 = sbr.rel (%p214_p2) target bundleno = 750 (0x2ee), region = 44  ;;  %1433 = vset.pattern.permute.xlu1 (!%p214_p2), %v1482_v1  ;;  %1432 = vset.pattern.permute.xlu0 (!%p214_p2), %v1482_v1  ;;  %v765_v3 = vld [vmem:[%s2035_s2] sm:$0xff] (!%p214_p2)  ;;  %v766_v4 = vld [vmem:[%s2035_s2 + $0x8] sm:$0xff] (!%p214_p2)  ;;  %v1373_v5 = vpack.c.bf16 (!%p214_p2), %v782_v2, %v781_v0  ;;  %v784_v8 = vld [vmem:[%s2035_s2 + $0x98] sm:$0xff] (!%p214_p2)  ;;  %v1484_v23 = vmov (!%p214_p2), 3   ;;  %v1485_v35 = vmov (!%p214_p2), 1   ;;  %v335_v2 = vlaneseq (!%p214_p2) }
   0x7   : > { %p244_p3 = scmp.lt.s32.totalorder (!%p214_p2), %s243_s23, 25  ;;  %v1375_v6 = vpack.c.bf16 (!%p214_p2), %v766_v4, %v765_v3  ;;  %v1377_v9 = vpack.c.bf16 (!%p214_p2), %v784_v8, %v783_v7  ;;  %v767_v10 = vld [vmem:[%s2035_s2 + $0x10] sm:$0xff] (!%p214_p2)  ;;  %v768_v11 = vld [vmem:[%s2035_s2 + $0x18] sm:$0xff] (!%p214_p2)  ;;  %v785_v13 = vld [vmem:[%s2035_s2 + $0xa0] sm:$0xff] (!%p214_p2)  ;;  %vm1487_vm0 = vmmov (!%p214_p2), 0   ;;  %vm962_vm1 = vcmask (!%p214_p2), 523264  }
   0x8   : > { %1374 = vmatprep.subr.bf16.mxu0 (!%p214_p2), %v1373_v5  ;;  %v1379_v12 = vpack.c.bf16 (!%p214_p2), %v768_v11, %v767_v10  ;;  %v786_v14 = vld [vmem:[%s2035_s2 + $0xa8] sm:$0xff] (!%p214_p2)  ;;  %v769_v18 = vld [vmem:[%s2035_s2 + $0x20] sm:$0xff] (!%p214_p2)  ;;  %v787_v20 = vld [vmem:[%s2035_s2 + $0xb0] sm:$0xff] (!%p214_p2)  ;;  %v336_v3 = vshrl.u32 (!%p214_p2), %v335_v2, 7  ;;  %vm1132_vm2 = vcmask (!%p214_p2), 64512  }
   0x9   : > { %1376 = vmatpush3.bf16.msra.mxu0 (!%p214_p2), %v1375_v6  ;;  %v1381_v17 = vpack.c.bf16 (!%p214_p2), %v786_v14, %v785_v13  ;;  %v770_v19 = vld [vmem:[%s2035_s2 + $0x28] sm:$0xff] (!%p214_p2)  ;;  %v788_v21 = vld [vmem:[%s2035_s2 + $0xb8] sm:$0xff] (!%p214_p2)  ;;  %v771_v26 = vld [vmem:[%s2035_s2 + $0x30] sm:$0xff] (!%p214_p2) }
   0xa   : > { %1378 = vmatprep.subr.bf16.mxu0 (!%p214_p2), %v1377_v9  ;;  %v1383_v24 = vpack.c.bf16 (!%p214_p2), %v770_v19, %v769_v18  ;;  %v1385_v25 = vpack.c.bf16 (!%p214_p2), %v788_v21, %v787_v20  ;;  %v772_v27 = vld [vmem:[%s2035_s2 + $0x38] sm:$0xff] (!%p214_p2)  ;;  %v789_v30 = vld [vmem:[%s2035_s2 + $0xc0] sm:$0xff] (!%p214_p2)  ;;  %v790_v31 = vld [vmem:[%s2035_s2 + $0xc8] sm:$0xff] (!%p214_p2)  ;;  %v337_v6 = vsub.s32 (!%p214_p2), 0, %v336_v3  ;;  %v371_v13 = vsub.s32 (!%p214_p2), 4, %v336_v3 }
   0xb   : > { %v1387_v29 = vpack.c.bf16 (!%p214_p2), %v772_v27, %v771_v26  ;;  %v1389_v32 = vpack.c.bf16 (!%p214_p2), %v790_v31, %v789_v30  ;;  %v773_v33 = vld [vmem:[%s2035_s2 + $0x40] sm:$0xff] (!%p214_p2)  ;;  %v774_v34 = vld [vmem:[%s2035_s2 + $0x48] sm:$0xff] (!%p214_p2)  ;;  %v791_v36 = vld [vmem:[%s2035_s2 + $0xd0] sm:$0xff] (!%p214_p2)  ;;  %v569_v14 = vsub.s32 (!%p214_p2), 2, %v336_v3  ;;  %v681_v19 = vsub.s32 (!%p214_p2), 3, %v336_v3 }
   0xc   : > { %v792_v37 = vld [vmem:[%s2035_s2 + $0xd8] sm:$0xff] (!%p214_p2)  ;;  %v1391_v38 = vpack.c.bf16 (!%p214_p2), %v774_v34, %v773_v33  ;;  %v775_v41 = vld [vmem:[%s2035_s2 + $0x50] sm:$0xff] (!%p214_p2)  ;;  %v793_v43 = vld [vmem:[%s2035_s2 + $0xe0] sm:$0xff] (!%p214_p2) }
   0xd   : > { %s2041_s23 = smov (!%p244_p3, %s243_s23), 25  ;;  %1380 = vmatpush3.bf16.msra.mxu0 %v1379_v12  ;;  %v1393_v40 = vpack.c.bf16 %v792_v37, %v791_v36  ;;  %v776_v42 = vld [vmem:[%s2035_s2 + $0x58] sm:$0xff]  ;;  %v794_v44 = vld [vmem:[%s2035_s2 + $0xe8] sm:$0xff]  ;;  %v777_v47 = vld [vmem:[%s2035_s2 + $0x60] sm:$0xff] }
   0xe   : > { %s1207_s16 = sshll.u32 %s2041_s23, 3  ;;  %1382 = vmatprep.subr.bf16.mxu0 %v1381_v17  ;;  %v1395_v45 = vpack.c.bf16 %v776_v42, %v775_v41  ;;  %v1397_v46 = vpack.c.bf16 %v794_v44, %v793_v43  ;;  %v778_v48 = vld [vmem:[%s2035_s2 + $0x68] sm:$0xff]  ;;  %v795_v49 = vld [vmem:[%s2035_s2 + $0xf0] sm:$0xff]  ;;  %v796_v50 = vld [vmem:[%s2035_s2 + $0xf8] sm:$0xff]  ;;  %v457_v17 = vsub.s32 1, %v336_v3 }
   0xf   : > { %s1566_s19 = scalar_lea.vmem %s2033_s0, %s1207_s16  ;;  %v1399_v52 = vpack.c.bf16 %v778_v48, %v777_v47  ;;  %v1401_v53 = vpack.c.bf16 %v796_v50, %v795_v49  ;;  %v779_v54 = vld [vmem:[%s2035_s2 + $0x70] sm:$0xff]  ;;  %v780_v55 = vld [vmem:[%s2035_s2 + $0x78] sm:$0xff]  ;;  %v268_v7 = vld [vmem:[%s2034_s1] sm:$0x1f]  ;;  %s2002_s10 = scalar_lea.vmem %s2039_s6, %s1207_s16 }
  0x10   : > { %v1575_v15 = vld [vmem:[%s1566_s19 + $0x8] sm:$0xff]  ;;  %v255_v16 = vld [vmem:[%s1566_s19] sm:$0xff]  ;;  %v1600_v28 = vld [vmem:[%s1566_s19 + $0x18] sm:$0xff]  ;;  %v1403_v57 = vpack.c.bf16 %v780_v55, %v779_v54  ;;  %v1722_v11 = vrot.slane %v268_v7, %v337_v6  ;;  %v1732_v21 = vrot.slane %v268_v7, %v371_v13  ;;  %v1748_v31 = vrot.slane %v268_v7, %v681_v19 }
  0x11   : > { %277 = vperm.xlu1 %1433, %v1575_v15   ;;  %272 = vperm.xlu0 %1432, %v255_v16   ;;  %v257_v39 = vld [vmem:[%s1566_s19 + $0x10] sm:$0xff]  ;;  %v260_v51 = vld [vmem:[%s1566_s19 + $0x28] sm:$0xff]  ;;  %v1660_v56 = vld [vmem:[%s1566_s19 + $0x40] sm:$0xff] }
  0x12   : > { %1384 = vmatpush3.bf16.msra.mxu0 %v1383_v24  ;;  %v259_v58 = vld [vmem:[%s1566_s19 + $0x20] sm:$0xff]  ;;  %v262_v59 = vld [vmem:[%s1566_s19 + $0x38] sm:$0xff]  ;;  %v1679_v60 = vld [vmem:[%s1566_s19 + $0x50] sm:$0xff] }
  0x13   : > { %1386 = vmatprep.subr.bf16.mxu0 %v1385_v25  ;;  %v261_v61 = vld [vmem:[%s1566_s19 + $0x30] sm:$0xff]  ;;  %v264_v62 = vld [vmem:[%s1566_s19 + $0x48] sm:$0xff]  ;;  %v1688_v63 = vld [vmem:[%s1566_s19 + $0x58] sm:$0xff]  ;;  %v1736_v25 = vrot.slane %v268_v7, %v569_v14 }
  0x14   : > { %v1698_v0 = vld [vmem:[%s1566_s19 + $0x60] sm:$0xff]  ;;  %v269_v8 = vld [vmem:[%s2034_s1 + $0x8] sm:$0x1f] }
  0x15   : > { %1434 = vset.pattern.permute.xlu1 %v1483_v22  ;;  %1436 = vset.pattern.permute.xlu0 %v1484_v23  ;;  %v1724_v12 = vrot.slane %v269_v8, %v337_v6  ;;  %v1734_v24 = vrot.slane %v269_v8, %v371_v13  ;;  %v1738_v26 = vrot.slane %v269_v8, %v569_v14 }
  0x16   : > { %516 = vperm.xlu1 %1434, %v255_v16   ;;  %628 = vperm.xlu0 %1436, %v255_v16   ;;  %v1745_v30 = vrot.slane %v269_v8, %v457_v17 }
  0x17   : > { %1388 = vmatpush3.bf16.msra.mxu0 %v1387_v29  ;;  %v1743_v29 = vrot.slane %v268_v7, %v457_v17 }
  0x18   : > { %1390 = vmatprep.subr.bf16.mxu0 %v1389_v32  ;;  %v1750_v32 = vrot.slane %v269_v8, %v681_v19 }
  0x1a   : > { %1435 = vset.pattern.permute.xlu1 %v1485_v35  ;;  %640 = vperm.xlu0 %1436, %v1600_v28  }
  0x1b   : > { %408 = vperm.xlu1 %1435, %v1575_v15   ;;  %1392 = vmatpush3.bf16.msra.mxu0 %v1391_v38 }
  0x1c   : > { %1394 = vmatprep.subr.bf16.mxu0 %v1393_v40 }
  0x1e   : > { %1445 = vset.pattern.permute.xlu0 %v1485_v35 }
  0x1f   : > { %1437 = vset.pattern.permute.xlu1 %v1482_v1  ;;  %404 = vperm.xlu0 %1445, %v255_v16  }
  0x20   : > { %282 = vperm.xlu1 %1437, %v257_v39   ;;  %1396 = vmatpush3.bf16.msra.mxu0 %v1395_v45 }
  0x21   : > { %1398 = vmatprep.subr.bf16.mxu0 %v1397_v46 }
  0x23   : > { %412 = vperm.xlu0 %1445, %v257_v39  }
  0x24   : > { %1438 = vset.pattern.permute.xlu1 %v1483_v22  ;;  %1400 = vmatpush3.bf16.msra.mxu0 %v1399_v52 }
  0x25   : > { %520 = vperm.xlu1 %1438, %v1575_v15   ;;  %1402 = vmatprep.subr.bf16.mxu0 %v1401_v53 }
  0x27   : > { %424 = vperm.xlu0 %1445, %v260_v51  }
  0x28   : > { %1404 = vmatpush3.bf16.msra.mxu0 %v1403_v57 }
  0x29   : > { %1439 = vset.pattern.permute.xlu1 %v1484_v23 }
  0x2a   : > { %632 = vperm.xlu1 %1439, %v1575_v15  }
  0x2b   : > { %436 = vperm.xlu0 %1445, %v1660_v56  }
  0x2e   : > { %1440 = vset.pattern.permute.xlu1 %v1482_v1 }
  0x2f   : > { %287 = vperm.xlu1 %1440, %v1600_v28   ;;  %1456 = vset.pattern.permute.xlu0 %v1483_v22 }
  0x30   : > { %524 = vperm.xlu0 %1456, %v257_v39  }
  0x33   : > { %1441 = vset.pattern.permute.xlu1 %v1485_v35 }
  0x34   : > { %416 = vperm.xlu1 %1441, %v1600_v28   ;;  %536 = vperm.xlu0 %1456, %v260_v51  }
  0x38   : > { %1442 = vset.pattern.permute.xlu1 %v1484_v23  ;;  %548 = vperm.xlu0 %1456, %v1660_v56  }
  0x39   : > { %636 = vperm.xlu1 %1442, %v257_v39  }
  0x3c   : > { %1459 = vset.pattern.permute.xlu0 %v1482_v1 }
  0x3d   : > { %1443 = vset.pattern.permute.xlu1 %v1483_v22  ;;  %292 = vperm.xlu0 %1459, %v259_v58  }
  0x3e   : > { %528 = vperm.xlu1 %1443, %v1600_v28  }
  0x41   : > { %307 = vperm.xlu0 %1459, %v262_v59  }
  0x42   : > { %1444 = vset.pattern.permute.xlu1 %v1485_v35 }
  0x43   : > { %420 = vperm.xlu1 %1444, %v259_v58  }
  0x45   : > { %322 = vperm.xlu0 %1459, %v1679_v60  }
  0x47   : > { %1446 = vset.pattern.permute.xlu1 %v1482_v1 }
  0x48   : > { %297 = vperm.xlu1 %1446, %v260_v51  }
  0x49   : > { %1462 = vset.pattern.permute.xlu0 %v1484_v23 }
  0x4a   : > { %652 = vperm.xlu0 %1462, %v261_v61  }
  0x4c   : > { %1447 = vset.pattern.permute.xlu1 %v1483_v22 }
  0x4d   : > { %532 = vperm.xlu1 %1447, %v259_v58  }
  0x4e   : > { %664 = vperm.xlu0 %1462, %v264_v62  }
  0x51   : > { %1448 = vset.pattern.permute.xlu1 %v1484_v23 }
  0x52   : > { %644 = vperm.xlu1 %1448, %v259_v58   ;;  %1467 = vset.pattern.permute.xlu0 %v1485_v35 }
  0x53   : > { %448 = vperm.xlu0 %1467, %v1688_v63  }
  0x56   : > { %1449 = vset.pattern.permute.xlu1 %v1482_v1 }
  0x57   : > { %302 = vperm.xlu1 %1449, %v261_v61   ;;  %1470 = vset.pattern.permute.xlu0 %v1483_v22 }
  0x58   : > { %560 = vperm.xlu0 %1470, %v1688_v63  }
  0x5b   : > { %1450 = vset.pattern.permute.xlu1 %v1485_v35 }
  0x5c   : > { %428 = vperm.xlu1 %1450, %v261_v61   ;;  %564 = vperm.xlu0 %1470, %v1698_v0  }
  0x60   : > { %1451 = vset.pattern.permute.xlu1 %v1484_v23  ;;  %1473 = vset.pattern.permute.xlu0 %v1484_v23 }
  0x61   : > { %648 = vperm.xlu1 %1451, %v260_v51  }
  0x65   : > { %1452 = vset.pattern.permute.xlu1 %v1483_v22 }
  0x66   : > { %540 = vperm.xlu1 %1452, %v261_v61  }
  0x6a   : > { %1453 = vset.pattern.permute.xlu1 %v1485_v35 }
  0x6b   : > { %432 = vperm.xlu1 %1453, %v262_v59  }
  0x6f   : > { %1454 = vset.pattern.permute.xlu1 %v1482_v1 }
  0x70   : > { %312 = vperm.xlu1 %1454, %v1660_v56  }
  0x74   : > { %1455 = vset.pattern.permute.xlu1 %v1483_v22 }
  0x75   : > { %544 = vperm.xlu1 %1455, %v262_v59  }
  0x79   : > { %1457 = vset.pattern.permute.xlu1 %v1484_v23 }
  0x7a   : > { %656 = vperm.xlu1 %1457, %v262_v59  }
  0x7e   : > { %1458 = vset.pattern.permute.xlu1 %v1482_v1 }
  0x7f   : > { %317 = vperm.xlu1 %1458, %v264_v62  }
  0x83   : > { %1460 = vset.pattern.permute.xlu1 %v1485_v35 }
  0x84   : > { %440 = vperm.xlu1 %1460, %v264_v62  }
  0x88   : > { %1461 = vset.pattern.permute.xlu1 %v1484_v23 }
  0x89   : > { %660 = vperm.xlu1 %1461, %v1660_v56  }
  0x8d   : > { %1463 = vset.pattern.permute.xlu1 %v1483_v22 }
  0x8e   : > { %552 = vperm.xlu1 %1463, %v264_v62  }
  0x90   : > { %v278_v4 = vpop.permute.xlu1 %277  ;;  %v273_v5 = vpop.permute.xlu0 %272 }
  0x91   : > { %v343_v15 = vmul.f32 %v1722_v11, %v273_v5  ;;  %v344_v16 = vmul.f32 %v1724_v12, %v273_v5  ;;  %v345_v37 = vmul.f32 %v1722_v11, %v278_v4  ;;  %v346_v38 = vmul.f32 %v1724_v12, %v278_v4 }
  0x92   : > { %1464 = vset.pattern.permute.xlu1 %v1485_v35 }
  0x93   : > { %444 = vperm.xlu1 %1464, %v1679_v60   ;;  %v377_v27 = vadd.f32 %v1732_v21, %v343_v15  ;;  %v378_v28 = vadd.f32 %v1734_v24, %v344_v16  ;;  %v379_v51 = vadd.f32 %v1732_v21, %v345_v37  ;;  %v380_v52 = vadd.f32 %v1734_v24, %v346_v38 }
  0x95   : > { %v517_v9 = vpop.permute.xlu1 %516  ;;  %v629_v10 = vpop.permute.xlu0 %628 }
  0x96   : > { %v575_v39 = vmul.f32 %v1736_v25, %v517_v9  ;;  %v576_v40 = vmul.f32 %v1738_v26, %v517_v9  ;;  %v687_v43 = vmul.f32 %v1748_v31, %v629_v10  ;;  %v688_v44 = vmul.f32 %v1750_v32, %v629_v10 }
  0x97   : > { %1465 = vset.pattern.permute.xlu1 %v1482_v1 }
  0x98   : > { %327 = vperm.xlu1 %1465, %v1688_v63  }
  0x99   : > { %v1730_v18 = vpop.permute.xlu0 %640 }
  0x9a   : > { %v409_v20 = vpop.permute.xlu1 %408 }
  0x9b   : > { %v465_v48 = vmul.f32 %v1743_v29, %v409_v20  ;;  %v466_v49 = vmul.f32 %v1745_v30, %v409_v20 }
  0x9c   : > { %1466 = vset.pattern.permute.xlu1 %v1483_v22 }
  0x9d   : > { %556 = vperm.xlu1 %1466, %v1679_v60   ;;  %v491_v58 = vadd.f32 %v465_v48, %v379_v51  ;;  %v492_v59 = vadd.f32 %v466_v49, %v380_v52  ;;  %v948_v48 = vld [vmem:[%s2037_s4 + $0x8] sm:$0xff]  ;;  %v694_v49 = vmul.f32 %v1750_v32, %v1730_v18 }
  0x9e   : > { %v405_v33 = vpop.permute.xlu0 %404 }
  0x9f   : > { %v463_v34 = vmul.f32 %v1743_v29, %v405_v33  ;;  %v464_v36 = vmul.f32 %v1745_v30, %v405_v33  ;;  %v283_v22 = vpop.permute.xlu1 %282 }
  0xa0   : > { %v347_v8 = vmul.f32 %v1722_v11, %v283_v22  ;;  %v348_v14 = vmul.f32 %v1724_v12, %v283_v22 }
  0xa1   : > { %v489_v41 = vadd.f32 %v463_v34, %v377_v27  ;;  %v490_v42 = vadd.f32 %v464_v36, %v378_v28  ;;  %1468 = vset.pattern.permute.xlu1 %v1484_v23 }
  0xa2   : > { %668 = vperm.xlu1 %1468, %v1679_v60   ;;  %v413_v45 = vpop.permute.xlu0 %412  ;;  %v382_v17 = vadd.f32 %v1734_v24, %v348_v14 }
  0xa3   : > { %v601_v46 = vadd.f32 %v575_v39, %v489_v41  ;;  %v602_v47 = vadd.f32 %v576_v40, %v490_v42  ;;  %v467_v16 = vmul.f32 %v1743_v29, %v413_v45  ;;  %v468_v19 = vmul.f32 %v1745_v30, %v413_v45 }
  0xa4   : > { %v521_v50 = vpop.permute.xlu1 %520  ;;  %v693_v45 = vmul.f32 %v1748_v31, %v1730_v18 }
  0xa5   : > { %v577_v53 = vmul.f32 %v1736_v25, %v521_v50  ;;  %v578_v54 = vmul.f32 %v1738_v26, %v521_v50  ;;  %v714_v56 = vadd.f32 %v688_v44, %v602_v47  ;;  %v713_v57 = vadd.f32 %v687_v43, %v601_v46  ;;  %v947_v47 = vld [vmem:[%s2037_s4] sm:$0xff] }
  0xa6   : > { %1469 = vset.pattern.permute.xlu1 %v1482_v1  ;;  %v1769_v55 = vpop.permute.xlu0 %424  ;;  %v494_v33 = vadd.f32 %v468_v19, %v382_v17 }
  0xa7   : > { %332 = vperm.xlu1 %1469, %v1698_v0   ;;  %v740_v60 = vmax.f32 %v714_v56, 0.0  ;;  %v739_v61 = vmax.f32 %v713_v57, 0.0  ;;  %v603_v2 = vadd.f32 %v577_v53, %v491_v58  ;;  %v604_v3 = vadd.f32 %v578_v54, %v492_v59  ;;  %v949_v56 = vld [vmem:[%s2037_s4 + $0x10] sm:$0xff]  ;;  %v950_v57 = vld [vmem:[%s2037_s4 + $0x18] sm:$0xff] }
  0xa8   : > { %v1486_v54 = vmov 0.0|0.0  }
  0xa9   : > { %v633_v62 = vpop.permute.xlu1 %632  ;;  %868 = vmatprep.mubr.f32.mxu0 %v740_v60  ;;  %1405 = vmatprep.subr.bf16.mxu1 %v1486_v54  ;;  %v1406_v60 = vpack.c.bf16 %v948_v48, %v947_v47 }
  0xaa   : > { %v689_v4 = vmul.f32 %v1748_v31, %v633_v62  ;;  %v690_v5 = vmul.f32 %v1750_v32, %v633_v62  ;;  %869 = vmatmul.mubr.f32.vlgmr.msra.gmra.mrb[0].mxu0 %v739_v61  ;;  %v1775_v1 = vpop.permute.xlu0 %436 }
  0xab   : > { %1471 = vset.pattern.permute.xlu1 %v1485_v35  ;;  %v381_v35 = vadd.f32 %v1732_v21, %v347_v8  ;;  %1407 = vmatpush3.bf16.msra.mxu1 %v1406_v60 }
  0xac   : > { %v715_v6 = vadd.f32 %v689_v4, %v603_v2  ;;  %v716_v7 = vadd.f32 %v690_v5, %v604_v3  ;;  %452 = vperm.xlu1 %1471, %v1698_v0   ;;  %v1409_v3 = vpack.c.bf16 %v950_v57, %v949_v56  ;;  %1408 = vmatprep.subr.bf16.mxu1 %v1486_v54 }
  0xae   : > { %v288_v9 = vpop.permute.xlu1 %287  ;;  %v742_v10 = vmax.f32 %v716_v7, 0.0  ;;  %v741_v13 = vmax.f32 %v715_v6, 0.0 }
  0xaf   : > { %v525_v15 = vpop.permute.xlu0 %524  ;;  %v350_v34 = vmul.f32 %v1724_v12, %v288_v9  ;;  %1410 = vmatpush3.bf16.msra.mxu1 %v1409_v3 }
  0xb0   : > { %1472 = vset.pattern.permute.xlu1 %v1484_v23  ;;  %873 = vmatprep.mubr.f32.mxu0 %v742_v10  ;;  %v579_v27 = vmul.f32 %v1736_v25, %v525_v15  ;;  %v580_v28 = vmul.f32 %v1738_v26, %v525_v15  ;;  %v493_v23 = vadd.f32 %v467_v16, %v381_v35 }
  0xb1   : > { %672 = vperm.xlu1 %1472, %v1688_v63   ;;  %874 = vmatmul.mubr.f32.gmra.mrb[2].mxu0 %v741_v13  ;;  %v349_v63 = vmul.f32 %v1722_v11, %v288_v9  ;;  %v384_v46 = vadd.f32 %v1734_v24, %v350_v34 }
  0xb2   : > { %v605_v36 = vadd.f32 %v579_v27, %v493_v23  ;;  %v606_v37 = vadd.f32 %v580_v28, %v494_v33  ;;  %1411 = vmatprep.subr.bf16.mxu1 %v1486_v54 }
  0xb3   : > { %v417_v20 = vpop.permute.xlu1 %416  ;;  %v1794_v41 = vpop.permute.xlu0 %536 }
  0xb4   : > { %v469_v38 = vmul.f32 %v1743_v29, %v417_v20  ;;  %v470_v42 = vmul.f32 %v1745_v30, %v417_v20 }
  0xb5   : > { %676 = vperm.xlu1 %1472, %v1698_v0   ;;  %v383_v0 = vadd.f32 %v1732_v21, %v349_v63 }
  0xb6   : > { %v496_v58 = vadd.f32 %v470_v42, %v384_v46  ;;  %v474_v46 = vmul.f32 %v1745_v30, %v1769_v55 }
  0xb7   : > { %v495_v50 = vadd.f32 %v469_v38, %v383_v0  ;;  %v1818_v61 = vpop.permute.xlu0 %548 }
  0xb8   : > { %v637_v22 = vpop.permute.xlu1 %636 }
  0xb9   : > { %v691_v39 = vmul.f32 %v1748_v31, %v637_v22  ;;  %v692_v40 = vmul.f32 %v1750_v32, %v637_v22 }
  0xbb   : > { %v717_v43 = vadd.f32 %v691_v39, %v605_v36  ;;  %v718_v44 = vadd.f32 %v692_v40, %v606_v37 }
  0xbc   : > { %v293_v9 = vpop.permute.xlu0 %292 }
  0xbd   : > { %v529_v51 = vpop.permute.xlu1 %528  ;;  %v744_v52 = vmax.f32 %v718_v44, 0.0  ;;  %v743_v53 = vmax.f32 %v717_v43, 0.0  ;;  %v351_v13 = vmul.f32 %v1722_v11, %v293_v9  ;;  %v352_v14 = vmul.f32 %v1724_v12, %v293_v9 }
  0xbe   : > { %v581_v59 = vmul.f32 %v1736_v25, %v529_v51  ;;  %v582_v18 = vmul.f32 %v1738_v26, %v529_v51  ;;  %v585_v51 = vmul.f32 %v1736_v25, %v1794_v41 }
  0xbf   : > { %878 = vmatprep.mubr.f32.mxu0 %v744_v52  ;;  %v385_v15 = vadd.f32 %v1732_v21, %v351_v13  ;;  %v386_v35 = vadd.f32 %v1734_v24, %v352_v14  ;;  %v586_v52 = vmul.f32 %v1738_v26, %v1794_v41 }
  0xc0   : > { %v607_v62 = vadd.f32 %v581_v59, %v495_v50  ;;  %v608_v2 = vadd.f32 %v582_v18, %v496_v58  ;;  %879 = vmatmul.mubr.f32.gmra.mrb[4].mxu0 %v743_v53  ;;  %v308_v44 = vpop.permute.xlu0 %307 }
  0xc2   : > { %v421_v4 = vpop.permute.xlu1 %420  ;;  %v720_v5 = vadd.f32 %v694_v49, %v608_v2  ;;  %v719_v6 = vadd.f32 %v693_v45, %v607_v62  ;;  %v473_v45 = vmul.f32 %v1743_v29, %v1769_v55 }
  0xc3   : > { %v471_v16 = vmul.f32 %v1743_v29, %v421_v4  ;;  %v472_v17 = vmul.f32 %v1745_v30, %v421_v4 }
  0xc4   : > { %v746_v7 = vmax.f32 %v720_v5, 0.0  ;;  %v745_v8 = vmax.f32 %v719_v6, 0.0  ;;  %v1840_v50 = vpop.permute.xlu0 %322 }
  0xc5   : > { %v497_v28 = vadd.f32 %v471_v16, %v385_v15  ;;  %v498_v23 = vadd.f32 %v472_v17, %v386_v35 }
  0xc6   : > { %883 = vmatprep.mubr.f32.mxu0 %v746_v7 }
  0xc7   : > { %v298_v10 = vpop.permute.xlu1 %297  ;;  %884 = vmatmul.mubr.f32.gmra.mrb[6].mxu0 %v745_v8 }
  0xc8   : > { %v353_v39 = vmul.f32 %v1722_v11, %v298_v10  ;;  %v354_v40 = vmul.f32 %v1724_v12, %v298_v10 }
  0xc9   : > { %v653_v4 = vpop.permute.xlu0 %652 }
  0xca   : > { %v387_v47 = vadd.f32 %v1732_v21, %v353_v39  ;;  %v388_v48 = vadd.f32 %v1734_v24, %v354_v40  ;;  %v699_v10 = vmul.f32 %v1748_v31, %v653_v4  ;;  %v700_v13 = vmul.f32 %v1750_v32, %v653_v4 }
  0xcb   : > { %v591_v39 = vmul.f32 %v1736_v25, %v1818_v61 }
  0xcc   : > { %v533_v19 = vpop.permute.xlu1 %532  ;;  %v499_v53 = vadd.f32 %v473_v45, %v387_v47  ;;  %v500_v56 = vadd.f32 %v474_v46, %v388_v48 }
  0xcd   : > { %v583_v20 = vmul.f32 %v1736_v25, %v533_v19  ;;  %v584_v27 = vmul.f32 %v1738_v26, %v533_v19 }
  0xce   : > { %v611_v59 = vadd.f32 %v585_v51, %v499_v53  ;;  %v612_v18 = vadd.f32 %v586_v52, %v500_v56 }
  0xcf   : > { %v609_v63 = vadd.f32 %v583_v20, %v497_v28  ;;  %v610_v34 = vadd.f32 %v584_v27, %v498_v23 }
  0xd1   : > { %v645_v33 = vpop.permute.xlu1 %644 }
  0xd2   : > { %v695_v36 = vmul.f32 %v1748_v31, %v645_v33  ;;  %v696_v22 = vmul.f32 %v1750_v32, %v645_v33 }
  0xd4   : > { %v721_v37 = vadd.f32 %v695_v36, %v609_v63  ;;  %v722_v38 = vadd.f32 %v696_v22, %v610_v34  ;;  %v357_v34 = vmul.f32 %v1722_v11, %v308_v44  ;;  %v479_v22 = vmul.f32 %v1743_v29, %v1775_v1 }
  0xd6   : > { %v303_v42 = vpop.permute.xlu1 %302  ;;  %v748_v0 = vmax.f32 %v722_v38, 0.0  ;;  %v747_v43 = vmax.f32 %v721_v37, 0.0  ;;  %v358_v37 = vmul.f32 %v1724_v12, %v308_v44 }
  0xd7   : > { %v355_v57 = vmul.f32 %v1722_v11, %v303_v42  ;;  %v356_v55 = vmul.f32 %v1724_v12, %v303_v42  ;;  %v391_v42 = vadd.f32 %v1732_v21, %v357_v34 }
  0xd8   : > { %888 = vmatprep.mubr.f32.mxu0 %v748_v0  ;;  %v392_v0 = vadd.f32 %v1734_v24, %v358_v37 }
  0xd9   : > { %889 = vmatmul.mubr.f32.gmra.mrb[8].mxu0 %v747_v43  ;;  %v389_v6 = vadd.f32 %v1732_v21, %v355_v57  ;;  %v390_v7 = vadd.f32 %v1734_v24, %v356_v55 }
  0xdb   : > { %v429_v49 = vpop.permute.xlu1 %428 }
  0xdc   : > { %v475_v2 = vmul.f32 %v1743_v29, %v429_v49  ;;  %v476_v3 = vmul.f32 %v1745_v30, %v429_v49 }
  0xde   : > { %v501_v15 = vadd.f32 %v475_v2, %v389_v6  ;;  %v502_v35 = vadd.f32 %v476_v3, %v390_v7  ;;  %v953_v6 = vld [vmem:[%s2037_s4 + $0x30] sm:$0xff]  ;;  %v954_v7 = vld [vmem:[%s2037_s4 + $0x38] sm:$0xff] }
  0xe0   : > { %v649_v58 = vpop.permute.xlu1 %648 }
  0xe1   : > { %v697_v60 = vmul.f32 %v1748_v31, %v649_v58  ;;  %v698_v62 = vmul.f32 %v1750_v32, %v649_v58 }
  0xe3   : > { %v723_v5 = vadd.f32 %v697_v60, %v611_v59  ;;  %v724_v41 = vadd.f32 %v698_v62, %v612_v18  ;;  %v951_v60 = vld [vmem:[%s2037_s4 + $0x20] sm:$0xff]  ;;  %v952_v62 = vld [vmem:[%s2037_s4 + $0x28] sm:$0xff] }
  0xe4   : > { %v1412_v3 = vpack.c.bf16 %v952_v62, %v951_v60 }
  0xe5   : > { %v541_v8 = vpop.permute.xlu1 %540  ;;  %v750_v9 = vmax.f32 %v724_v41, 0.0  ;;  %v749_v14 = vmax.f32 %v723_v5, 0.0 }
  0xe6   : > { %v587_v16 = vmul.f32 %v1736_v25, %v541_v8  ;;  %v588_v17 = vmul.f32 %v1738_v26, %v541_v8  ;;  %1413 = vmatpush3.bf16.msra.mxu1 %v1412_v3  ;;  %v480_v8 = vmul.f32 %v1745_v30, %v1775_v1 }
  0xe7   : > { %893 = vmatprep.mubr.f32.mxu0 %v750_v9  ;;  %1414 = vmatprep.subr.bf16.mxu1 %v1486_v54  ;;  %v592_v54 = vmul.f32 %v1738_v26, %v1818_v61 }
  0xe8   : > { %v613_v19 = vadd.f32 %v587_v16, %v501_v15  ;;  %v614_v20 = vadd.f32 %v588_v17, %v502_v35  ;;  %894 = vmatmul.mubr.f32.gmra.mrb[10].mxu0 %v749_v14  ;;  %v1488_v15 = vmov 0.0  }
  0xe9   : > { %1334 = vmatprep.mubr.msk.f32.mxu1 %vm1487_vm0, %v1488_v15 }
  0xea   : > { %v725_v27 = vadd.f32 %v699_v10, %v613_v19  ;;  %v726_v28 = vadd.f32 %v700_v13, %v614_v20  ;;  %v433_v23 = vpop.permute.xlu1 %432  ;;  %v1415_v10 = vpack.c.bf16 %v954_v7, %v953_v6 }
  0xeb   : > { %v477_v43 = vmul.f32 %v1743_v29, %v433_v23  ;;  %v478_v45 = vmul.f32 %v1745_v30, %v433_v23 }
  0xec   : > { %v752_v33 = vmax.f32 %v726_v28, 0.0  ;;  %v751_v63 = vmax.f32 %v725_v27, 0.0  ;;  %1416 = vmatpush3.bf16.msra.mxu1 %v1415_v10  ;;  %v665_v28 = vpop.permute.xlu0 %664 }
  0xed   : > { %v503_v51 = vadd.f32 %v477_v43, %v391_v42  ;;  %v504_v52 = vadd.f32 %v478_v45, %v392_v0  ;;  %v705_v37 = vmul.f32 %v1748_v31, %v665_v28 }
  0xee   : > { %898 = vmatprep.mubr.f32.mxu0 %v752_v33 }
  0xef   : > { %v313_v36 = vpop.permute.xlu1 %312  ;;  %899 = vmatmul.mubr.f32.gmra.mrb[12].mxu0 %v751_v63 }
  0xf0   : > { %v359_v38 = vmul.f32 %v1722_v11, %v313_v36  ;;  %v360_v2 = vmul.f32 %v1724_v12, %v313_v36  ;;  %v449_v7 = vpop.permute.xlu0 %448 }
  0xf2   : > { %v393_v40 = vadd.f32 %v1732_v21, %v359_v38  ;;  %v394_v9 = vadd.f32 %v1734_v24, %v360_v2  ;;  %v706_v38 = vmul.f32 %v1750_v32, %v665_v28 }
  0xf4   : > { %v505_v46 = vadd.f32 %v479_v22, %v393_v40  ;;  %v545_v47 = vpop.permute.xlu1 %544  ;;  %v506_v14 = vadd.f32 %v480_v8, %v394_v9 }
  0xf5   : > { %v589_v48 = vmul.f32 %v1736_v25, %v545_v47  ;;  %v590_v44 = vmul.f32 %v1738_v26, %v545_v47 }
  0xf6   : > { %v617_v49 = vadd.f32 %v591_v39, %v505_v46  ;;  %v618_v17 = vadd.f32 %v592_v54, %v506_v14 }
  0xf7   : > { %v615_v56 = vadd.f32 %v589_v48, %v503_v51  ;;  %v616_v57 = vadd.f32 %v590_v44, %v504_v52 }
  0xf9   : > { %v657_v53 = vpop.permute.xlu1 %656 }
  0xfa   : > { %v701_v55 = vmul.f32 %v1748_v31, %v657_v53  ;;  %v702_v58 = vmul.f32 %v1750_v32, %v657_v53  ;;  %v363_v53 = vmul.f32 %v1722_v11, %v1840_v50 }
  0xfc   : > { %v727_v59 = vadd.f32 %v701_v55, %v615_v56  ;;  %v728_v18 = vadd.f32 %v702_v58, %v616_v57  ;;  %v364_v56 = vmul.f32 %v1724_v12, %v1840_v50 }
  0xfe   : > { %v318_v4 = vpop.permute.xlu1 %317  ;;  %v754_v5 = vmax.f32 %v728_v18, 0.0  ;;  %v753_v41 = vmax.f32 %v727_v59, 0.0  ;;  %v397_v59 = vadd.f32 %v1732_v21, %v363_v53  ;;  %v398_v18 = vadd.f32 %v1734_v24, %v364_v56 }
  0xff   : > { %v361_v35 = vmul.f32 %v1722_v11, %v318_v4  ;;  %v362_v16 = vmul.f32 %v1724_v12, %v318_v4 }
 0x100   : > { %903 = vmatprep.mubr.f32.mxu0 %v754_v5 }
 0x101   : > { %904 = vmatmul.mubr.f32.gmra.mrb[14].mxu0 %v753_v41  ;;  %v395_v63 = vadd.f32 %v1732_v21, %v361_v35  ;;  %v396_v34 = vadd.f32 %v1734_v24, %v362_v16 }
 0x103   : > { %v441_v13 = vpop.permute.xlu1 %440 }
 0x104   : > { %v481_v27 = vmul.f32 %v1743_v29, %v441_v13  ;;  %v482_v61 = vmul.f32 %v1745_v30, %v441_v13 }
 0x106   : > { %v507_v40 = vadd.f32 %v481_v27, %v395_v63  ;;  %v508_v42 = vadd.f32 %v482_v61, %v396_v34 }
 0x108   : > { %v661_v1 = vpop.permute.xlu1 %660 }
 0x109   : > { %v703_v19 = vmul.f32 %v1748_v31, %v661_v1  ;;  %v704_v20 = vmul.f32 %v1750_v32, %v661_v1 }
 0x10b   : > { %v729_v23 = vadd.f32 %v703_v19, %v617_v49  ;;  %v730_v33 = vadd.f32 %v704_v20, %v618_v17  ;;  %v485_v17 = vmul.f32 %v1743_v29, %v449_v7  ;;  %v486_v19 = vmul.f32 %v1745_v30, %v449_v7  ;;  %v561_v20 = vpop.permute.xlu0 %560 }
 0x10d   : > { %v553_v36 = vpop.permute.xlu1 %552  ;;  %v756_v22 = vmax.f32 %v730_v33, 0.0  ;;  %v755_v39 = vmax.f32 %v729_v23, 0.0 }
 0x10e   : > { %v593_v0 = vmul.f32 %v1736_v25, %v553_v36  ;;  %v594_v43 = vmul.f32 %v1738_v26, %v553_v36  ;;  %v597_v36 = vmul.f32 %v1736_v25, %v561_v20 }
 0x10f   : > { %908 = vmatprep.mubr.f32.mxu0 %v756_v22  ;;  %v598_v22 = vmul.f32 %v1738_v26, %v561_v20 }
 0x110   : > { %v619_v45 = vadd.f32 %v593_v0, %v507_v40  ;;  %v620_v46 = vadd.f32 %v594_v43, %v508_v42  ;;  %909 = vmatmul.mubr.f32.gmra.mrb[16].mxu0 %v755_v39 }
 0x112   : > { %v731_v47 = vadd.f32 %v705_v37, %v619_v45  ;;  %v732_v48 = vadd.f32 %v706_v38, %v620_v46  ;;  %v445_v44 = vpop.permute.xlu1 %444  ;;  %v565_v37 = vpop.permute.xlu0 %564 }
 0x113   : > { %v483_v57 = vmul.f32 %v1743_v29, %v445_v44  ;;  %v484_v55 = vmul.f32 %v1745_v30, %v445_v44  ;;  %v600_v42 = vmul.f32 %v1738_v26, %v565_v37 }
 0x114   : > { %v758_v49 = vmax.f32 %v732_v48, 0.0  ;;  %v757_v51 = vmax.f32 %v731_v47, 0.0 }
 0x115   : > { %v509_v2 = vadd.f32 %v483_v57, %v397_v59  ;;  %v510_v3 = vadd.f32 %v484_v55, %v398_v18  ;;  %v1942_v55 = vld [vmem:[%s2036_s3] ss:$0 sm:$0xff] }
 0x116   : > { %913 = vmatprep.mubr.f32.mxu0 %v758_v49 }
 0x117   : > { %v328_v52 = vpop.permute.xlu1 %327  ;;  %914 = vmatmul.mubr.f32.gmra.mrb[18].mxu0 %v757_v51 }
 0x118   : > { %v365_v10 = vmul.f32 %v1722_v11, %v328_v52  ;;  %v366_v13 = vmul.f32 %v1724_v12, %v328_v52 }
 0x11a   : > { %v399_v16 = vadd.f32 %v1732_v21, %v365_v10  ;;  %v400_v1 = vadd.f32 %v1734_v24, %v366_v13 }
 0x11c   : > { %v557_v58 = vpop.permute.xlu1 %556  ;;  %v511_v63 = vadd.f32 %v485_v17, %v399_v16  ;;  %v512_v34 = vadd.f32 %v486_v19, %v400_v1 }
 0x11d   : > { %v595_v60 = vmul.f32 %v1736_v25, %v557_v58  ;;  %v596_v62 = vmul.f32 %v1738_v26, %v557_v58 }
 0x11e   : > { %v623_v0 = vadd.f32 %v597_v36, %v511_v63 }
 0x11f   : > { %v621_v5 = vadd.f32 %v595_v60, %v509_v2  ;;  %v622_v41 = vadd.f32 %v596_v62, %v510_v3 }
 0x121   : > { %v669_v4 = vpop.permute.xlu1 %668 }
 0x122   : > { %v707_v50 = vmul.f32 %v1748_v31, %v669_v4  ;;  %v708_v6 = vmul.f32 %v1750_v32, %v669_v4 }
 0x124   : > { %v733_v8 = vadd.f32 %v707_v50, %v621_v5  ;;  %v734_v9 = vadd.f32 %v708_v6, %v622_v41 }
 0x126   : > { %v333_v54 = vpop.permute.xlu1 %332  ;;  %v760_v14 = vmax.f32 %v734_v9, 0.0  ;;  %v759_v35 = vmax.f32 %v733_v8, 0.0 }
 0x127   : > { %v367_v27 = vmul.f32 %v1722_v11, %v333_v54  ;;  %v368_v61 = vmul.f32 %v1724_v12, %v333_v54  ;;  %v599_v12 = vmul.f32 %v1736_v25, %v565_v37 }
 0x128   : > { %918 = vmatprep.mubr.f32.mxu0 %v760_v14 }
 0x129   : > { %919 = vmatmul.mubr.f32.gmra.mrb[20].mxu0 %v759_v35  ;;  %v401_v38 = vadd.f32 %v1732_v21, %v367_v27  ;;  %v402_v39 = vadd.f32 %v1734_v24, %v368_v61 }
 0x12b   : > { %v453_v28 = vpop.permute.xlu1 %452 }
 0x12c   : > { %v487_v23 = vmul.f32 %v1743_v29, %v453_v28  ;;  %v488_v33 = vmul.f32 %v1745_v30, %v453_v28  ;;  %v624_v30 = vadd.f32 %v598_v22, %v512_v34 }
 0x12e   : > { %v513_v40 = vadd.f32 %v487_v23, %v401_v38  ;;  %v514_v11 = vadd.f32 %v488_v33, %v402_v39 }
 0x130   : > { %v673_v29 = vpop.permute.xlu1 %672  ;;  %v625_v48 = vadd.f32 %v599_v12, %v513_v40  ;;  %v626_v44 = vadd.f32 %v600_v42, %v514_v11 }
 0x131   : > { %v709_v43 = vmul.f32 %v1748_v31, %v673_v29  ;;  %v710_v45 = vmul.f32 %v1750_v32, %v673_v29 }
 0x133   : > { %v735_v46 = vadd.f32 %v709_v43, %v623_v0  ;;  %v736_v47 = vadd.f32 %v710_v45, %v624_v30 }
 0x134   : > { %v677_v21 = vpop.permute.xlu1 %676 }
 0x135   : > { %v711_v24 = vmul.f32 %v1748_v31, %v677_v21  ;;  %v712_v49 = vmul.f32 %v1750_v32, %v677_v21  ;;  %v762_v51 = vmax.f32 %v736_v47, 0.0  ;;  %v761_v25 = vmax.f32 %v735_v46, 0.0 }
 0x137   : > { %v737_v52 = vadd.f32 %v711_v24, %v625_v48  ;;  %v738_v26 = vadd.f32 %v712_v49, %v626_v44  ;;  %923 = vmatprep.mubr.f32.mxu0 %v762_v51 }
 0x138   : > { %924 = vmatmul.mubr.f32.gmra.mrb[22].mxu0 %v761_v25 }
 0x139   : > { %v763_v53 = vmax.f32 %v737_v52, 0.0  ;;  %v764_v56 = vmax.f32 %v738_v26, 0.0 }
 0x13b   : > { %928 = vmatprep.mubr.f32.mxu0 %v764_v56 }
 0x13c   : > { %929 = vmatmul.mubr.f32.gmra.mrb[24].mxu0 %v763_v53 }
 0x17d   : > { %v1258_v57 = vpop.f32.mrb[0].mxu0 }
 0x17e   : > { %v1259_v58 = vpop.f32.mrb[1].mxu0 }
 0x17f   : > { %v1260_v31 = vadd.f32 %v1259_v58, %v1258_v57 }
 0x181   : > { %v871_v32 = vadd.f32 %v1260_v31, %v1942_v55 }
 0x183   : > { %v934_v59 = vmax.f32 %v871_v32, 0.0  ;;  %v1210_v32 = vld [vmem:[%s2038_s5] ss:$0 sm:$0xff] }
 0x184   : > { %v1261_v18 = vpop.f32.mrb[2].mxu0 }
 0x185   : > { %v1262_v60 = vpop.f32.mrb[3].mxu0  ;;  %1335 = vmatmul.mubr.msk.f32.vlgmr.msra.gmra.mrb[0].mxu1 %vm962_vm1, %v934_v59 }
 0x186   : > { %v1263_v62 = vadd.f32 %v1262_v60, %v1261_v18  ;;  %1337 = vmatprep.mubr.msk.f32.mxu1 %vm1487_vm0, %v1488_v15 }
 0x188   : > { %v876_v2 = vadd.f32 %v1263_v62, %v1942_v55 }
 0x18a   : > { %v935_v3 = vmax.f32 %v876_v2, 0.0 }
 0x18c   : > { %1338 = vmatmul.mubr.msk.f32.gmra.mrb[2].mxu1 %vm962_vm1, %v935_v3 }
 0x18d   : > { %1340 = vmatprep.mubr.msk.f32.mxu1 %vm1487_vm0, %v1488_v15 }
 0x193   : > { %v1264_v4 = vpop.f32.mrb[4].mxu0 }
 0x194   : > { %v1265_v5 = vpop.f32.mrb[5].mxu0 }
 0x195   : > { %v1266_v41 = vadd.f32 %v1265_v5, %v1264_v4 }
 0x197   : > { %v881_v50 = vadd.f32 %v1266_v41, %v1942_v55 }
 0x199   : > { %v936_v6 = vmax.f32 %v881_v50, 0.0 }
 0x19a   : > { %v1267_v7 = vpop.f32.mrb[6].mxu0 }
 0x19b   : > { %v1268_v8 = vpop.f32.mrb[7].mxu0  ;;  %1341 = vmatmul.mubr.msk.f32.gmra.mrb[4].mxu1 %vm962_vm1, %v936_v6 }
 0x19c   : > { %v1269_v9 = vadd.f32 %v1268_v8, %v1267_v7  ;;  %1343 = vmatprep.mubr.msk.f32.mxu1 %vm1487_vm0, %v1488_v15 }
 0x19e   : > { %v886_v10 = vadd.f32 %v1269_v9, %v1942_v55 }
 0x1a0   : > { %v937_v13 = vmax.f32 %v886_v10, 0.0 }
 0x1a2   : > { %1344 = vmatmul.mubr.msk.f32.gmra.mrb[6].mxu1 %vm962_vm1, %v937_v13 }
 0x1a3   : > { %1346 = vmatprep.mubr.msk.f32.mxu1 %vm1487_vm0, %v1488_v15 }
 0x1ac   : > { %v1270_v54 = vpop.f32.mrb[8].mxu0 }
 0x1ad   : > { %v1271_v14 = vpop.f32.mrb[9].mxu0 }
 0x1ae   : > { %v1272_v35 = vadd.f32 %v1271_v14, %v1270_v54 }
 0x1b0   : > { %v891_v16 = vadd.f32 %v1272_v35, %v1942_v55 }
 0x1b2   : > { %v938_v1 = vmax.f32 %v891_v16, 0.0 }
 0x1b4   : > { %1347 = vmatmul.mubr.msk.f32.gmra.mrb[8].mxu1 %vm962_vm1, %v938_v1 }
 0x1b5   : > { %1349 = vmatprep.mubr.msk.f32.mxu1 %vm1487_vm0, %v1488_v15 }
 0x1bb   : > { %v1273_v17 = vpop.f32.mrb[10].mxu0 }
 0x1bc   : > { %v1274_v19 = vpop.f32.mrb[11].mxu0 }
 0x1bd   : > { %v1275_v20 = vadd.f32 %v1274_v19, %v1273_v17 }
 0x1bf   : > { %v896_v27 = vadd.f32 %v1275_v20, %v1942_v55 }
 0x1c1   : > { %v939_v61 = vmax.f32 %v896_v27, 0.0 }
 0x1c2   : > { %v1276_v28 = vpop.f32.mrb[12].mxu0 }
 0x1c3   : > { %v1277_v23 = vpop.f32.mrb[13].mxu0  ;;  %1350 = vmatmul.mubr.msk.f32.gmra.mrb[10].mxu1 %vm962_vm1, %v939_v61 }
 0x1c4   : > { %v1278_v33 = vadd.f32 %v1277_v23, %v1276_v28  ;;  %1352 = vmatprep.mubr.msk.f32.mxu1 %vm1487_vm0, %v1488_v15 }
 0x1c6   : > { %v901_v63 = vadd.f32 %v1278_v33, %v1942_v55 }
 0x1c8   : > { %v940_v34 = vmax.f32 %v901_v63, 0.0 }
 0x1ca   : > { %1353 = vmatmul.mubr.msk.f32.gmra.mrb[12].mxu1 %vm962_vm1, %v940_v34 }
 0x1cb   : > { %1355 = vmatprep.mubr.msk.f32.mxu1 %vm1487_vm0, %v1488_v15 }
 0x1d4   : > { %v1279_v36 = vpop.f32.mrb[14].mxu0 }
 0x1d5   : > { %v1280_v22 = vpop.f32.mrb[15].mxu0 }
 0x1d6   : > { %v1281_v37 = vadd.f32 %v1280_v22, %v1279_v36 }
 0x1d8   : > { %v906_v38 = vadd.f32 %v1281_v37, %v1942_v55 }
 0x1da   : > { %v941_v39 = vmax.f32 %v906_v38, 0.0 }
 0x1dc   : > { %1356 = vmatmul.mubr.msk.f32.gmra.mrb[14].mxu1 %vm962_vm1, %v941_v39 }
 0x1dd   : > { %1358 = vmatprep.mubr.msk.f32.mxu1 %vm1487_vm0, %v1488_v15 }
 0x1e3   : > { %v1282_v40 = vpop.f32.mrb[16].mxu0 }
 0x1e4   : > { %v1283_v11 = vpop.f32.mrb[17].mxu0 }
 0x1e5   : > { %v1284_v12 = vadd.f32 %v1283_v11, %v1282_v40 }
 0x1e7   : > { %v911_v42 = vadd.f32 %v1284_v12, %v1942_v55 }
 0x1e9   : > { %v942_v29 = vmax.f32 %v911_v42, 0.0 }
 0x1ea   : > { %v1285_v0 = vpop.f32.mrb[18].mxu0 }
 0x1eb   : > { %v1286_v30 = vpop.f32.mrb[19].mxu0  ;;  %1359 = vmatmul.mubr.msk.f32.gmra.mrb[16].mxu1 %vm962_vm1, %v942_v29 }
 0x1ec   : > { %v1287_v43 = vadd.f32 %v1286_v30, %v1285_v0  ;;  %1361 = vmatprep.mubr.msk.f32.mxu1 %vm1487_vm0, %v1488_v15 }
 0x1ee   : > { %v916_v45 = vadd.f32 %v1287_v43, %v1942_v55 }
 0x1f0   : > { %v943_v46 = vmax.f32 %v916_v45, 0.0 }
 0x1f2   : > { %1362 = vmatmul.mubr.msk.f32.gmra.mrb[18].mxu1 %vm962_vm1, %v943_v46 }
 0x1f3   : > { %1364 = vmatprep.mubr.msk.f32.mxu1 %vm1487_vm0, %v1488_v15 }
 0x1fc   : > { %v1288_v47 = vpop.f32.mrb[20].mxu0 }
 0x1fd   : > { %v1289_v48 = vpop.f32.mrb[21].mxu0 }
 0x1fe   : > { %v1290_v44 = vadd.f32 %v1289_v48, %v1288_v47 }
 0x200   : > { %v921_v21 = vadd.f32 %v1290_v44, %v1942_v55 }
 0x202   : > { %v944_v24 = vmax.f32 %v921_v21, 0.0 }
 0x204   : > { %1365 = vmatmul.mubr.msk.f32.gmra.mrb[20].mxu1 %vm962_vm1, %v944_v24 }
 0x205   : > { %1367 = vmatprep.mubr.msk.f32.mxu1 %vm1487_vm0, %v1488_v15 }
 0x20b   : > { %v1291_v49 = vpop.f32.mrb[22].mxu0 }
 0x20c   : > { %v1292_v51 = vpop.f32.mrb[23].mxu0 }
 0x20d   : > { %v1293_v25 = vadd.f32 %v1292_v51, %v1291_v49 }
 0x20f   : > { %v926_v52 = vadd.f32 %v1293_v25, %v1942_v55  ;;  %v1294_v26 = vpop.f32.mrb[24].mxu0 }
 0x210   : > { %v1295_v53 = vpop.f32.mrb[25].mxu0 }
 0x211   : > { %v945_v56 = vmax.f32 %v926_v52, 0.0  ;;  %v1296_v57 = vadd.f32 %v1295_v53, %v1294_v26 }
 0x213   : > { %v931_v58 = vadd.f32 %v1296_v57, %v1942_v55  ;;  %1368 = vmatmul.mubr.msk.f32.gmra.mrb[22].mxu1 %vm962_vm1, %v945_v56 }
 0x214   : > { %1370 = vmatprep.mubr.msk.f32.mxu1 %vm1487_vm0, %v1488_v15 }
 0x215   : > { %v946_v31 = vmax.f32 %v931_v58, 0.0 }
 0x217   : > { %1371 = vmatmul.mubr.msk.f32.gmra.mrb[24].mxu1 %vm962_vm1, %v946_v31 }
 0x258   : > { %v1068_v55 = vpop.f32.mrb[0].mxu1 }
 0x259   : > { %v1069_v15 = vadd.f32 %v1210_v32, %v1068_v55  ;;  %v1336_v59 = vpop.f32.mrb[1].mxu1 }
 0x25b   : > { %1133 = vst.msk [vmem:[%s2002_s10] sm:$0xff] %vm1132_vm2, %v1069_v15 }
 0x25f   : > { %v1073_v18 = vpop.f32.mrb[2].mxu1 }
 0x260   : > { %v1074_v60 = vadd.f32 %v1210_v32, %v1073_v18  ;;  %v1339_v62 = vpop.f32.mrb[3].mxu1 }
 0x262   : > { %1134 = vst.msk [vmem:[%s2002_s10 + $0x8] sm:$0xff] %vm1132_vm2, %v1074_v60 }
 0x26e   : > { %v1078_v2 = vpop.f32.mrb[4].mxu1 }
 0x26f   : > { %v1079_v3 = vadd.f32 %v1210_v32, %v1078_v2  ;;  %v1342_v4 = vpop.f32.mrb[5].mxu1 }
 0x271   : > { %1135 = vst.msk [vmem:[%s2002_s10 + $0x10] sm:$0xff] %vm1132_vm2, %v1079_v3 }
 0x275   : > { %v1083_v5 = vpop.f32.mrb[6].mxu1 }
 0x276   : > { %v1084_v41 = vadd.f32 %v1210_v32, %v1083_v5  ;;  %v1345_v50 = vpop.f32.mrb[7].mxu1 }
 0x278   : > { %1136 = vst.msk [vmem:[%s2002_s10 + $0x18] sm:$0xff] %vm1132_vm2, %v1084_v41 }
 0x287   : > { %v1088_v6 = vpop.f32.mrb[8].mxu1 }
 0x288   : > { %v1089_v7 = vadd.f32 %v1210_v32, %v1088_v6  ;;  %v1348_v8 = vpop.f32.mrb[9].mxu1 }
 0x28a   : > { %1137 = vst.msk [vmem:[%s2002_s10 + $0x20] sm:$0xff] %vm1132_vm2, %v1089_v7 }
 0x296   : > { %v1093_v9 = vpop.f32.mrb[10].mxu1 }
 0x297   : > { %v1094_v10 = vadd.f32 %v1210_v32, %v1093_v9  ;;  %v1351_v13 = vpop.f32.mrb[11].mxu1 }
 0x299   : > { %1138 = vst.msk [vmem:[%s2002_s10 + $0x28] sm:$0xff] %vm1132_vm2, %v1094_v10 }
 0x29d   : > { %v1098_v54 = vpop.f32.mrb[12].mxu1 }
 0x29e   : > { %v1099_v14 = vadd.f32 %v1210_v32, %v1098_v54  ;;  %v1354_v35 = vpop.f32.mrb[13].mxu1 }
 0x2a0   : > { %1139 = vst.msk [vmem:[%s2002_s10 + $0x30] sm:$0xff] %vm1132_vm2, %v1099_v14 }
 0x2af   : > { %v1103_v16 = vpop.f32.mrb[14].mxu1 }
 0x2b0   : > { %v1104_v1 = vadd.f32 %v1210_v32, %v1103_v16  ;;  %v1357_v17 = vpop.f32.mrb[15].mxu1 }
 0x2b2   : > { %1140 = vst.msk [vmem:[%s2002_s10 + $0x38] sm:$0xff] %vm1132_vm2, %v1104_v1 }
 0x2be   : > { %v1108_v19 = vpop.f32.mrb[16].mxu1 }
 0x2bf   : > { %v1109_v20 = vadd.f32 %v1210_v32, %v1108_v19  ;;  %v1360_v27 = vpop.f32.mrb[17].mxu1 }
 0x2c1   : > { %1141 = vst.msk [vmem:[%s2002_s10 + $0x40] sm:$0xff] %vm1132_vm2, %v1109_v20 }
 0x2c5   : > { %v1113_v61 = vpop.f32.mrb[18].mxu1 }
 0x2c6   : > { %v1114_v28 = vadd.f32 %v1210_v32, %v1113_v61  ;;  %v1363_v23 = vpop.f32.mrb[19].mxu1 }
 0x2c8   : > { %1142 = vst.msk [vmem:[%s2002_s10 + $0x48] sm:$0xff] %vm1132_vm2, %v1114_v28 }
 0x2d7   : > { %v1118_v33 = vpop.f32.mrb[20].mxu1 }
 0x2d8   : > { %v1119_v63 = vadd.f32 %v1210_v32, %v1118_v33  ;;  %v1366_v34 = vpop.f32.mrb[21].mxu1 }
 0x2da   : > { %1143 = vst.msk [vmem:[%s2002_s10 + $0x50] sm:$0xff] %vm1132_vm2, %v1119_v63 }
 0x2e6   : > { %v1123_v36 = vpop.f32.mrb[22].mxu1 }
 0x2e7   : > { %v1124_v22 = vadd.f32 %v1210_v32, %v1123_v36  ;;  %v1369_v37 = vpop.f32.mrb[23].mxu1 }
 0x2e9   : > { %1144 = vst.msk [vmem:[%s2002_s10 + $0x58] sm:$0xff] %vm1132_vm2, %v1124_v22 }
 0x2ea   : > { %v1128_v38 = vpop.f32.mrb[24].mxu1 }
 0x2eb   : > { %v1129_v39 = vadd.f32 %v1210_v32, %v1128_v38  ;;  %v1372_v40 = vpop.f32.mrb[25].mxu1 }
 0x2ed   : > { %1145 = vst.msk [vmem:[%s2002_s10 + $0x60] sm:$0xff] %vm1132_vm2, %v1129_v39 }
 0x2ee PF: > { %s16_s21 = sadd.s32 1, %s1480_s21  }
 0x2ef   : > { %p13_p4 = scmp.ge.s32.totalorder %s16_s21, 4  }
 0x2f1   :  { %15 = sbr.rel (!%p13_p4) target bundleno = 1 (0x1), region = 74 }

</bundles_post_ra>
